<compile_context>
chip_gen: v7x
topology: tpu7x:2x2x1
jax: 0.10.0
libtpu: 0.0.40
codegen_flags: <defaults>
</compile_context>

<pallas_src>
import jax
import jax.numpy as jnp
from jax.experimental import pallas as pl
from jax.experimental.pallas import tpu as pltpu

LANE_W = 1024          # lane-dense minor dim (large multiple of 128 -> unmasked vst)
MAX_TILE_ROWS = 1024   # (1024, 1024) f32 block = 4 MiB; safe on v5e/v6e/v7x
MIN_GRID_STEPS = 4     # >=2 so v7x megacore shards; 4 for balance + pipeline overlap


def _snake_kernel(scal_ref, x_ref, o_ref):
    # scal_ref: (2,) f32 in SMEM = [a, 1/a]  (reciprocal hoisted to the wrapper)
    # x_ref / o_ref: (tile_rows, lane_w) blocks in VMEM
    a = scal_ref[0]
    inv_a = scal_ref[1]
    x = x_ref[...].astype(jnp.float32)        # compute in f32 even for bf16 I/O
    s = jnp.sin(a * x)
    o_ref[...] = (x + (s * s) * inv_a).astype(o_ref.dtype)


def _round_up(v, m):
    return ((v + m - 1) // m) * m


def _pick_tile_rows(rows):
    """Tile rows: multiple of 8, <= MAX_TILE_ROWS, targeting >= MIN_GRID_STEPS steps."""
    if rows <= 8:
        return rows                                # single full-extent block
    target = pl.cdiv(rows, MIN_GRID_STEPS)
    tr = max(8, _round_up(target, 8))
    return min(MAX_TILE_ROWS, tr, rows)


def _snake_2d(x2, scal, tile_rows):
    rows, lanes = x2.shape
    grid = (pl.cdiv(rows, tile_rows),)
    return pl.pallas_call(
        _snake_kernel,
        out_shape=jax.ShapeDtypeStruct(x2.shape, x2.dtype),
        grid=grid,
        in_specs=[
            pl.BlockSpec(memory_space=pltpu.MemorySpace.SMEM),       # [a, 1/a]
            pl.BlockSpec((tile_rows, lanes), lambda i: (i, 0)),      # x tile
        ],
        out_specs=pl.BlockSpec((tile_rows, lanes), lambda i: (i, 0)),
        compiler_params=pltpu.CompilerParams(
            dimension_semantics=("parallel",),       # shard rows across v7x's 2 TCs
            vmem_limit_bytes=48 << 20,               # 4 MiB blocks x 2 bufs x (in+out) + headroom
        ),
    )(scal, x2)


def learned_snake(x, a):
    """x: any-shape float array; a: (1,) learned scalar.  y = x + sin(a*x)^2 / a."""
    orig_shape = x.shape
    n = x.size

    a_f32 = a.astype(jnp.float32).reshape(())
    scal = jnp.stack([a_f32, 1.0 / a_f32])           # hoisted reciprocal -> SMEM

    flat = x.reshape(-1)
    rows = n // LANE_W

    if n % LANE_W == 0:
        # Aligned fast path (common case): free reshape, no pad, no slice.
        x2 = flat.reshape(rows, LANE_W)
        return _snake_2d(x2, scal, _pick_tile_rows(rows)).reshape(orig_shape)

    if rows == 0:
        # Tiny input (< 1024 elems): single full-extent block, grid=(1,).
        x2 = flat.reshape(1, n)
        return _snake_2d(x2, scal, 1).reshape(orig_shape)

    # Unaligned: kernel on the aligned bulk (no full-array pad), <1024-element
    # tail in plain JAX, stitched once.  Replaces the old pad + prefix-slice
    # pair of extra HBM passes.
    n_bulk = rows * LANE_W
    bulk = flat[:n_bulk].reshape(rows, LANE_W)
    bulk_out = _snake_2d(bulk, scal, _pick_tile_rows(rows)).reshape(-1)
    tail = flat[n_bulk:].astype(jnp.float32)
    s = jnp.sin(a_f32 * tail)
    tail_out = (tail + (s * s) / a_f32).astype(x.dtype)
    return jnp.concatenate([bulk_out, tail_out]).reshape(orig_shape)


if __name__ == "__main__":
    key = jax.random.PRNGKey(0)
    k_a, k_x = jax.random.split(key)

    # Deterministic parameter init (mirrors nn.Parameter(torch.randn(1)))
    a = jax.random.normal(k_a, (1,), dtype=jnp.float32)

    # Small NCHW input consistent with the module (pure elementwise op)
    x = jax.random.normal(k_x, (2, 4, 16, 16), dtype=jnp.float32)

    y = learned_snake(x, a)
    y = jax.block_until_ready(y)

    # Pure-JAX reference check
    y_ref = x + jnp.square(jnp.sin(a[0] * x)) / a[0]
    assert y.shape == x.shape and y.dtype == x.dtype
    assert jnp.allclose(y, y_ref, atol=1e-5, rtol=1e-5)

    print("KERNEL_OK")
</pallas_src>

<mosaic_0001>
module attributes {stable_mosaic.version = 11 : i64} {
  func.func @_snake_kernel(%arg0: i32, %arg1: memref<2xf32, #tpu.memory_space<smem>>, %arg2: memref<2x1024xf32, #tpu.memory_space<vmem>>, %arg3: memref<2x1024xf32, #tpu.memory_space<vmem>>) attributes {dimension_semantics = [#tpu.dimension_semantics<parallel>], iteration_bounds = array<i64: 1>, scalar_prefetch = 0 : i64, scratch_operands = 0 : i64, tpu.core_type = #tpu.core_type<tc>, window_params = [{transform_indices = @transform_0, window_bounds = array<i64: 2>}, {transform_indices = @transform_1, window_bounds = array<i64: 2, 1024>}, {transform_indices = @transform_2, window_bounds = array<i64: 2, 1024>}]} {
    %c0 = arith.constant 0 : index
    %0 = memref.load %arg1[%c0] : memref<2xf32, #tpu.memory_space<smem>>
    %c1 = arith.constant 1 : index
    %1 = memref.load %arg1[%c1] : memref<2xf32, #tpu.memory_space<smem>>
    %c0_0 = arith.constant 0 : index
    %c0_1 = arith.constant 0 : index
    %2 = vector.load %arg2[%c0_0, %c0_1] : memref<2x1024xf32, #tpu.memory_space<vmem>>, vector<2x1024xf32>
    %3 = vector.broadcast %0 : f32 to vector<2x1024xf32>
    %4 = arith.mulf %3, %2 : vector<2x1024xf32>
    %5 = math.sin %4 : vector<2x1024xf32>
    %6 = arith.mulf %5, %5 : vector<2x1024xf32>
    %7 = vector.broadcast %1 : f32 to vector<2x1024xf32>
    %8 = arith.mulf %6, %7 : vector<2x1024xf32>
    %9 = arith.addf %2, %8 : vector<2x1024xf32>
    %c0_2 = arith.constant 0 : index
    %c0_3 = arith.constant 0 : index
    %10 = vector.load %arg3[%c0_2, %c0_3] : memref<2x1024xf32, #tpu.memory_space<vmem>>, vector<2x1024xf32>
    tpu.vector_store %arg3[%c0_2, %c0_3], %9 {strides = array<i32>} : memref<2x1024xf32, #tpu.memory_space<vmem>>, vector<2x1024xf32>,
    return
  }
  func.func @transform_0(%arg0: i32) -> i32 {
    %c0_i32 = arith.constant 0 : i32
    %c0_i32_0 = arith.constant 0 : i32
    return %c0_i32 : i32
  }
  func.func @transform_1(%arg0: i32) -> (i32, i32) {
    %c0_i32 = arith.constant 0 : i32
    %c0_i32_0 = arith.constant 0 : i32
    return %arg0, %c0_i32 : i32, i32
  }
  func.func @transform_2(%arg0: i32) -> (i32, i32) {
    %c0_i32 = arith.constant 0 : i32
    %c0_i32_0 = arith.constant 0 : i32
    return %arg0, %c0_i32 : i32, i32
  }
}

</mosaic_0001>

<bundles_post_ra>
// kernel: tpu_custom_call.1
= control target key start
LH: loop header
LB: loop body
LE: loop exit
PB: predicated region body
PF: predicated region fallthrough
CT: control target
= control target key end

     0   :  { %7 = vsyncpa [#allocation5], 0  ;;  %s510_s0 = inlined_call_operand.hbm [shape: f32[2], index: 0, kind: input, shape index: {}]   ;;  %s511_s1 = inlined_call_operand.hbm [shape: f32[2,1024], index: 1, kind: input, shape index: {}]   ;;  %s512_s2 = inlined_call_operand.hbm [shape: f32[2,1024], index: 2, kind: output, shape index: {}]  }
   0x1   :  { %8 = vsyncpa [#allocation3], 0 }
   0x2   :  { %9 = vsyncpa [#allocation4], 0  ;;  %s309_s11 = scalar_lea.hbm %s510_s0, 16 }
   0x3   :  { %p310_p0 = scmp.ne.s32.totalorder %s510_s0, %s309_s11  ;;  %p313_p1 = scmp.lt.u32.totalorder %s309_s11, %s510_s0 }
   0x5   :  { %p315_p2 = pnand %p313_p1, %p310_p0 }
   0x7   :  { %318 = shalt.err (!%p315_p2)
}
   0x8   :  { %s369_s16 = smov [#allocation2]   ;;  %s370_s19 = smov [#allocation6]  }
   0x9   :  { %17 = dma.hbm_to_smem %s510_s0, 16, %s369_s16, [#allocation5]  }
   0xa   :  { %s24_s20 = sshll.u32 %s370_s19, 4  ;;  %s319_s23 = scalar_lea.hbm %s511_s1, 256  ;;  %s25_s20 = int_to_ptr.vmem [resolvable:$true] %s24_s20 }
   0xb   :  { %p320_p3 = scmp.ne.s32.totalorder %s511_s1, %s319_s23  ;;  %p323_p4 = scmp.lt.u32.totalorder %s319_s23, %s511_s1 }
   0xd   :  { %p325_p5 = pnand %p323_p4, %p320_p3 }
   0xf   :  { %328 = shalt.err (!%p325_p5)
}
  0x10   :  { %s329_s28 = scalar_lea.vmem %s25_s20, 256  ;;  %p334_p7 = scmp.lt.s32.totalorder %s25_s20, %s25_s20 }
  0x11   :  { %p330_p6 = scmp.ne.s32.totalorder %s25_s20, %s329_s28  ;;  %p335_p8 = scmp.lt.s32.totalorder %s329_s28, %s329_s28 }
  0x13   :  { %p336_p9 = por %p335_p8, %p334_p7 }
  0x15   :  { %p337_p10 = pnand %p336_p9, %p330_p6 }
  0x17   :  { %340 = shalt.err (!%p337_p10)
}
  0x18   :  { %27 = dma.hbm_to_vmem [thread:$0]  %s511_s1, 256, %s25_s20, [#allocation3]  }
  0x19   :  { %363 = dma.done.wait [#allocation5], 16  }
  0x1a   :  { %364 = vsyncadd [#allocation5], 4294967280 }
  0x1b   :  { %365 = dma.done.wait [#allocation3], 256  }
  0x1c   :  { %366 = vsyncadd [#allocation3], 4294967040 }
  0x1d   :  { %34 = sfence }
  0x1e   :  { %s35_s30 = sld [smem:[#allocation2]]  ;;  %v417_v0 = vld [vmem:[#allocation6] sm:$0xff]  ;;  %v419_v1 = vld [vmem:[#allocation6 + $0x8] sm:$0xff]  ;;  %v371_v27 = vmov 683565275   ;;  %s490_s1 = sld [smem:[#allocation2 + $0x1]] }
  0x1f   :  { %v372_v29 = vmov 2475754826   ;;  %v373_v31 = vmov 2131351028   ;;  %v374_v33 = vmov 2102212464  }
  0x20   :  { %v375_v35 = vmov 920167782   ;;  %v376_v43 = vmov 1326507024   ;;  %s377_s3 = smov [#allocation7]  }
  0x21   :  { %s265_s4 = sshll.u32 %s377_s3, 4  ;;  %s266_s4 = int_to_ptr.vmem [resolvable:$true] %s265_s4 }
  0x22   :  { %s341_s5 = scalar_lea.vmem %s266_s4, 256  ;;  %p346_p12 = scmp.lt.s32.totalorder %s266_s4, %s266_s4 }
  0x23   :  { %p342_p11 = scmp.ne.s32.totalorder %s266_s4, %s341_s5  ;;  %p347_p13 = scmp.lt.s32.totalorder %s341_s5, %s341_s5 }
  0x24   :  { %v39_v2 = vstv %s35_s30 }
  0x25   :  { %v422_v3 = vmul.f32 %v39_v2, %v417_v0  ;;  %v425_v4 = vmul.f32 %v39_v2, %v419_v1  ;;  %p348_p0 = por %p347_p13, %p346_p12 }
  0x27   :  { %v42_v5 = vand.u32 2147483647, %v422_v3  ;;  %v45_v6 = vand.u32 2139095040, %v422_v3  ;;  %v146_v7 = vand.u32 2147483647, %v425_v4  ;;  %v149_v8 = vand.u32 2139095040, %v425_v4  ;;  %p349_p1 = pnand %p348_p0, %p342_p11 }
  0x28   :  { %vm44_vm14 = vcmp.lt.s32.totalorder %v422_v3, 0 }
  0x29   :  { %v46_v9 = vshrl.u32 %v45_v6, 23  ;;  %v49_v10 = vand.u32 8388607, %v42_v5  ;;  %v150_v11 = vshrl.u32 %v149_v8, 23  ;;  %v153_v12 = vand.u32 8388607, %v146_v7 }
  0x2a   :  { %vm43_vm15 = vcmp.le.f32.partialorder %v42_v5, 0.7853982 }
  0x2b   :  { %v276_v13 = vadd.s32 4294967169, %v46_v9  ;;  %v280_v14 = vadd.s32 4294967169, %v150_v11  ;;  %v50_v16 = vor.u32 8388608, %v49_v10  ;;  %v154_v17 = vor.u32 8388608, %v153_v12 }
  0x2d   :  { %v52_v15 = vadd.s32 1, %v276_v13  ;;  %v156_v18 = vadd.s32 1, %v280_v14  ;;  %v435_v23 = vshll.u32 %v50_v16, 8  ;;  %v437_v25 = vshll.u32 %v154_v17, 8 }
  0x2f   :  { %vm53_vm0 = vcmp.gt.s32.totalorder %v52_v15, 0  ;;  %vm157_vm1 = vcmp.gt.s32.totalorder %v156_v18, 0 }
  0x30   :  { %v54_v19 = vsel %vm53_vm0, %v52_v15, 0  ;;  %v158_v22 = vsel %vm157_vm1, %v156_v18, 0  ;;  %vm148_vm0 = vcmp.lt.s32.totalorder %v425_v4, 0  ;;  %vm147_vm1 = vcmp.le.f32.partialorder %v146_v7, 0.7853982 }
  0x31   :  { %v55_v20 = vshrl.u32 %v54_v19, 5  ;;  %v56_v21 = vand.u32 31, %v54_v19  ;;  %v160_v24 = vand.u32 31, %v158_v22  ;;  %v439_v37 = vshrl.u32 %v158_v22, 5 }
  0x33   :  { %v57_v26 = vsub.s32 32, %v56_v21  ;;  %v59_v28 = vshll.u32 %v371_v27, %v56_v21  ;;  %v62_v30 = vshll.u32 %v372_v29, %v56_v21  ;;  %v65_v32 = vshll.u32 %v373_v31, %v56_v21 }
  0x34   :  { %v68_v34 = vshll.u32 %v374_v33, %v56_v21  ;;  %v71_v36 = vshll.u32 %v375_v35, %v56_v21  ;;  %vm74_vm2 = vcmp.lt.s32.totalorder %v55_v20, 1  ;;  %vm75_vm3 = vcmp.lt.s32.totalorder %v55_v20, 2 }
  0x35   :  { %v58_v38 = vshrl.u32 %v371_v27, %v57_v26  ;;  %v60_v39 = vshrl.u32 %v372_v29, %v57_v26  ;;  %v63_v40 = vshrl.u32 %v373_v31, %v57_v26  ;;  %v66_v41 = vshrl.u32 %v374_v33, %v57_v26 }
  0x36   :  { %v69_v42 = vshrl.u32 %v375_v35, %v57_v26  ;;  %v72_v44 = vshrl.u32 %v376_v43, %v57_v26  ;;  %vm77_vm4 = vcmp.lt.s32.totalorder %v55_v20, 4  ;;  %v161_v48 = vsub.s32 32, %v160_v24 }
  0x37   :  { %v61_v45 = vor.u32 %v60_v39, %v59_v28  ;;  %v64_v46 = vor.u32 %v63_v40, %v62_v30  ;;  %v67_v47 = vor.u32 %v66_v41, %v65_v32  ;;  %vm76_vm5 = vcmp.lt.s32.totalorder %v55_v20, 3 }
  0x38   :  { %v70_v49 = vor.u32 %v69_v42, %v68_v34  ;;  %v73_v50 = vor.u32 %v72_v44, %v71_v36  ;;  %v163_v51 = vshll.u32 %v371_v27, %v160_v24  ;;  %v166_v59 = vshll.u32 %v372_v29, %v160_v24 }
  0x39   :  { %v78_v52 = vsel %vm74_vm2, %v58_v38, %v61_v45  ;;  %v79_v53 = vsel %vm77_vm4, %v67_v47, 2102212464  ;;  %v82_v54 = vsel %vm74_vm2, %v61_v45, %v64_v46  ;;  %v86_v55 = vsel %vm74_vm2, %v64_v46, %v67_v47 }
  0x3a   :  { %v80_v56 = vsel %vm76_vm5, %v64_v46, %v79_v53  ;;  %v83_v57 = vsel %vm77_vm4, %v70_v49, 920167782  ;;  %v87_v58 = vsel %vm77_vm4, %v73_v50, 1326507024  ;;  %v162_v62 = vshrl.u32 %v371_v27, %v161_v48 }
  0x3b   :  { %v84_v60 = vsel %vm76_vm5, %v67_v47, %v83_v57  ;;  %v88_v61 = vsel %vm76_vm5, %v70_v49, %v87_v58  ;;  %v164_v63 = vshrl.u32 %v372_v29, %v161_v48  ;;  %v81_v2 = vsel %vm75_vm3, %v78_v52, %v80_v56 }
  0x3c   :  { %v85_v6 = vsel %vm75_vm3, %v82_v54, %v84_v60  ;;  %v89_v8 = vsel %vm75_vm3, %v86_v55, %v88_v61  ;;  %v167_v9 = vshrl.u32 %v373_v31, %v161_v48  ;;  %v169_v16 = vshll.u32 %v373_v31, %v160_v24 }
  0x3d   :  { %v448_v10 = vmul.u32.u64.low %v435_v23, %v89_v8  ;;  %v449_v11 = vmul.u32.u64.high %v435_v23, %v89_v8, %v448_v10  ;;  %v452_v12 = vmul.u32.u64.low %v435_v23, %v85_v6  ;;  %v453_v13 = vmul.u32.u64.high %v435_v23, %v85_v6, %v452_v12 }
  0x3e   :  { %v165_v14 = vor.u32 %v164_v63, %v163_v51  ;;  %v168_v15 = vor.u32 %v167_v9, %v166_v59  ;;  %v170_v17 = vshrl.u32 %v374_v33, %v161_v48  ;;  %v172_v18 = vshll.u32 %v374_v33, %v160_v24 }
  0x3f   :  { %v173_v19 = vshrl.u32 %v375_v35, %v161_v48  ;;  %v175_v21 = vshll.u32 %v375_v35, %v160_v24  ;;  %v176_v22 = vshrl.u32 %v376_v43, %v161_v48  ;;  %v97_v20 = vmul.u32 %v435_v23, %v81_v2 }
  0x40   :  { %v171_v26 = vor.u32 %v170_v17, %v169_v16  ;;  %vm178_vm6 = vcmp.lt.s32.totalorder %v439_v37, 1  ;;  %vm179_vm7 = vcmp.lt.s32.totalorder %v439_v37, 2  ;;  %vm99_vm8 = vc.u32 %v449_v11, %v452_v12 }
  0x41   :  { %v100_v27 = vadd.s32 1, %v453_v13  ;;  %v174_v28 = vor.u32 %v173_v19, %v172_v18  ;;  %vm180_vm9 = vcmp.lt.s32.totalorder %v439_v37, 3  ;;  %v177_v29 = vor.u32 %v176_v22, %v175_v21 }
  0x42   :  { %vm181_vm10 = vcmp.lt.s32.totalorder %v439_v37, 4  ;;  %v182_v30 = vsel %vm178_vm6, %v162_v62, %v165_v14  ;;  %v186_v24 = vsel %vm178_vm6, %v165_v14, %v168_v15  ;;  %v190_v33 = vsel %vm178_vm6, %v168_v15, %v171_v26 }
  0x43   :  { %v101_v31 = vsel %vm99_vm8, %v100_v27, %v453_v13  ;;  %v183_v23 = vsel %vm181_vm10, %v171_v26, 2102212464  ;;  %v187_v32 = vsel %vm181_vm10, %v174_v28, 920167782  ;;  %v191_v38 = vsel %vm181_vm10, %v177_v29, 1326507024 }
  0x44   :  { %v102_v34 = vadd.s32 %v101_v31, %v97_v20  ;;  %v184_v35 = vsel %vm180_vm9, %v168_v15, %v183_v23  ;;  %v188_v36 = vsel %vm180_vm9, %v171_v26, %v187_v32  ;;  %v192_v41 = vsel %vm180_vm9, %v174_v28, %v191_v38 }
  0x45   :  { %v185_v39 = vsel %vm179_vm7, %v182_v30, %v184_v35  ;;  %v189_v40 = vsel %vm179_vm7, %v186_v24, %v188_v36  ;;  %v193_v43 = vsel %vm179_vm7, %v190_v33, %v192_v41  ;;  %v98_v62 = vadd.s32 %v452_v12, %v449_v11 }
  0x46   :  { %v103_v42 = vadd.s32 536870912, %v102_v34  ;;  %v470_v44 = vmul.u32.u64.low %v437_v25, %v189_v40  ;;  %v471_v45 = vmul.u32.u64.high %v437_v25, %v189_v40, %v470_v44  ;;  %v201_v49 = vmul.u32 %v437_v25, %v185_v39 }
  0x47   :  { %v474_v46 = vmul.u32.u64.low %v437_v25, %v193_v43  ;;  %v475_v47 = vmul.u32.u64.high %v437_v25, %v193_v43, %v474_v46  ;;  %vm134_vm5 = vweird.f32 %v422_v3  ;;  %vm238_vm9 = vweird.f32 %v425_v4 }
  0x48   :  { %v104_v48 = vshrl.u32 %v103_v42, 30  ;;  %v204_v51 = vadd.s32 1, %v471_v45 }
  0x49   :  { %vm203_vm11 = vc.u32 %v475_v47, %v470_v44  ;;  %v202_v21 = vadd.s32 %v470_v44, %v475_v47 }
  0x4a   :  { %v105_v50 = vshll.u32 %v104_v48, 30  ;;  %v205_v37 = vsel %vm203_vm11, %v204_v51, %v471_v45  ;;  %v128_v11 = vsub.s32 4, %v104_v48 }
  0x4b   :  { %v206_v53 = vadd.s32 %v205_v37, %v201_v49 }
  0x4c   :  { %v106_v52 = vsub.s32 %v102_v34, %v105_v50  ;;  %v129_v31 = vsel %vm44_vm14, %v128_v11, %v104_v48 }
  0x4d   :  { %v207_v55 = vadd.s32 536870912, %v206_v53  ;;  %v131_v35 = vsel %vm43_vm15, 0, %v129_v31 }
  0x4e   :  { %v108_v54 = vsub.s32 0, %v106_v52  ;;  %v135_v41 = vadd.s32 3, %v131_v35 }
  0x4f   :  { %v208_v57 = vshrl.u32 %v207_v55, 30 }
  0x50   :  { %v277_v56 = vmin.u32 %v108_v54, %v106_v52  ;;  %v136_v44 = vand.u32 3, %v135_v41 }
  0x51   :  { %v209_v59 = vshll.u32 %v208_v57, 30  ;;  %v232_v40 = vsub.s32 4, %v208_v57 }
  0x52   :  { %v110_v58 = vclz %v277_v56  ;;  %vm141_vm2 = vcmp.eq.s32.totalorder %v136_v44, 2  ;;  %vm138_vm3 = vcmp.eq.s32.totalorder %v136_v44, 0  ;;  %vm137_vm4 = vcmp.lt.s32.totalorder %v136_v44, 2 }
  0x53   :  { %v210_v61 = vsub.s32 %v206_v53, %v209_v59  ;;  %v233_v43 = vsel %vm148_vm0, %v232_v40, %v208_v57  ;;  %v252_v56 = vstv %s490_s1 }
  0x54   :  { %v278_v60 = vadd.s32 4294967294, %v110_v58  ;;  %v235_v47 = vsel %vm147_vm1, 0, %v233_v43 }
  0x55   :  { %v212_v63 = vsub.s32 0, %v210_v61  ;;  %v239_v51 = vadd.s32 3, %v235_v47 }
  0x56   :  { %vm279_vm12 = vcmp.lt.s32.totalorder %v278_v60, 0 }
  0x57   :  { %v113_v25 = vsel %vm279_vm12, 0, %v278_v60  ;;  %v281_v9 = vmin.u32 %v212_v63, %v210_v61  ;;  %v240_v54 = vand.u32 3, %v239_v51 }
  0x58   :  { %v114_v2 = vsub.s32 32, %v113_v25  ;;  %v115_v6 = vshll.u32 %v106_v52, %v113_v25  ;;  %v118_v8 = vsub.s32 4294967266, %v113_v25 }
  0x59   :  { %v214_v14 = vclz %v281_v9  ;;  %vm245_vm6 = vcmp.eq.s32.totalorder %v240_v54, 2  ;;  %vm242_vm7 = vcmp.eq.s32.totalorder %v240_v54, 0  ;;  %vm241_vm8 = vcmp.lt.s32.totalorder %v240_v54, 2 }
  0x5a   :  { %v116_v10 = vshrl.u32 %v98_v62, %v114_v2  ;;  %v119_v13 = vadd.s32 127, %v118_v8 }
  0x5b   :  { %v282_v17 = vadd.s32 4294967294, %v214_v14 }
  0x5c   :  { %v117_v15 = vor.u32 %v116_v10, %v115_v6  ;;  %v120_v16 = vshll.u32 %v119_v13, 23 }
  0x5d   :  { %vm283_vm13 = vcmp.lt.s32.totalorder %v282_v17, 0 }
  0x5e   :  { %v121_v18 = vor.u32 4788187, %v120_v16  ;;  %v124_v19 = vcvt.s32.f32 %v117_v15  ;;  %v217_v12 = vsel %vm283_vm13, 0, %v282_v17 }
  0x5f   :  { %v218_v20 = vsub.s32 32, %v217_v12  ;;  %v219_v26 = vshll.u32 %v210_v61, %v217_v12  ;;  %v222_v27 = vsub.s32 4294967266, %v217_v12 }
  0x60   :  { %v122_v22 = vand.u32 2147483647, %v121_v18 }
  0x61   :  { %v220_v29 = vshrl.u32 %v202_v21, %v218_v20  ;;  %v223_v30 = vadd.s32 127, %v222_v27 }
  0x62   :  { %v125_v28 = vmul.f32 %v124_v19, %v122_v22 }
  0x63   :  { %v221_v23 = vor.u32 %v220_v29, %v219_v26  ;;  %v224_v32 = vshll.u32 %v223_v30, 23 }
  0x64   :  { %v126_v24 = vxor.u32 2147483648, %v125_v28 }
  0x65   :  { %v225_v36 = vor.u32 4788187, %v224_v32  ;;  %v228_v38 = vcvt.s32.f32 %v221_v23 }
  0x66   :  { %v127_v33 = vsel %vm44_vm14, %v126_v24, %v125_v28 }
  0x67   :  { %v130_v34 = vsel %vm43_vm15, %v422_v3, %v127_v33  ;;  %v226_v39 = vand.u32 2147483647, %v225_v36 }
  0x68   :  { %301 = vcosq.f32 %v130_v34 }
  0x69   :  { %303 = vsinq.f32 %v130_v34  ;;  %v229_v42 = vmul.f32 %v228_v38, %v226_v39 }
  0x6b   :  { %v230_v5 = vxor.u32 2147483648, %v229_v42 }
  0x6d   :  { %v231_v45 = vsel %vm148_vm0, %v230_v5, %v229_v42 }
  0x6e   :  { %v234_v46 = vsel %vm147_vm1, %v425_v4, %v231_v45 }
  0x6f   :  { %305 = vcosq.f32 %v234_v46 }
  0x70   :  { %307 = vsinq.f32 %v234_v46 }
  0x72   :  { %v302_v48 = vpop.eup %301 }
  0x73   :  { %v304_v49 = vpop.eup %303  ;;  %v142_v50 = vxor.u32 2147483648, %v302_v48 }
  0x74   :  { %v139_v7 = vxor.u32 2147483648, %v304_v49 }
  0x75   :  { %v143_v52 = vsel %vm141_vm2, %v142_v50, %v304_v49 }
  0x76   :  { %v140_v37 = vsel %vm138_vm3, %v302_v48, %v139_v7 }
  0x77   :  { %v144_v53 = vsel %vm137_vm4, %v140_v37, %v143_v52 }
  0x78   :  { %v145_v55 = vsel %vm134_vm5, nan, %v144_v53 }
  0x79   :  { %v250_v57 = vmul.f32 %v145_v55, %v145_v55  ;;  %v306_v58 = vpop.eup %305 }
  0x7a   :  { %v308_v60 = vpop.eup %307  ;;  %v246_v61 = vxor.u32 2147483648, %v306_v58 }
  0x7b   :  { %v253_v59 = vmul.f32 %v252_v56, %v250_v57  ;;  %v243_v62 = vxor.u32 2147483648, %v308_v60 }
  0x7c   :  { %v247_v3 = vsel %vm245_vm6, %v246_v61, %v308_v60 }
  0x7d   :  { %v255_v25 = vadd.f32 %v253_v59, %v417_v0  ;;  %v244_v63 = vsel %vm242_vm7, %v306_v58, %v243_v62 }
  0x7e   :  { %v248_v2 = vsel %vm241_vm8, %v244_v63, %v247_v3 }
  0x7f   :  { %257 = vst [vmem:[#allocation7] sm:$0xff] %v255_v25  ;;  %v249_v6 = vsel %vm238_vm9, nan, %v248_v2 }
  0x80   :  { %v251_v8 = vmul.f32 %v249_v6, %v249_v6 }
  0x82   :  { %v254_v9 = vmul.f32 %v252_v56, %v251_v8 }
  0x84   :  { %v256_v10 = vadd.f32 %v254_v9, %v419_v1 }
  0x86   :  { %258 = vst [vmem:[#allocation7 + $0x8] sm:$0xff] %v256_v10 }
  0x87   :  { %352 = shalt.err (!%p349_p1)
}
  0x88   :  { %s353_s8 = scalar_lea.hbm %s512_s2, 256 }
  0x89   :  { %p354_p2 = scmp.ne.s32.totalorder %s512_s2, %s353_s8  ;;  %p357_p3 = scmp.lt.u32.totalorder %s353_s8, %s512_s2 }
  0x8b   :  { %p359_p4 = pnand %p357_p3, %p354_p2 }
  0x8d   :  { %362 = shalt.err (!%p359_p4)
}
  0x8e   :  { %268 = dma.vmem_to_hbm [thread:$0]  %s266_s4, 256, %s512_s2, [#allocation4]  }
  0x8f   :  { %367 = dma.done.wait [#allocation4], 256  }
  0x90   :  { %368 = vsyncadd [#allocation4], 4294967040 }
  0x91   :  { %272 = vsyncpa [#allocation3], 1 }
  0x92   :  { %273 = vsyncpa [#allocation4], 1 }
  0x93   :  { %274 = vsyncpa [#allocation5], 1 }

</bundles_post_ra>
